<compile_context>
chip_gen: v7x
topology: tpu7x:2x2x1
jax: 0.10.0
libtpu: 0.0.40
codegen_flags: <defaults>
</compile_context>

<pallas_src>
import functools

import jax
import jax.numpy as jnp
import numpy as np
from jax.experimental import pallas as pl
from jax.experimental.pallas import tpu as pltpu


def _periodic_qhead_kernel(x_ref, w_ref, b_ref, o_ref, *, H, W, Nb):
    """One block of Nb batch elements per grid step.

    x_ref: (Nb, C, S) VMEM  — activations, S = H*W on the lane axis
    w_ref: (9, C)     VMEM  — conv taps, row t = 3*dy + dx
    b_ref: (1,)       SMEM  — conv bias
    o_ref: (Nb, S)    VMEM  — Q-value maps (flattened, lane+sublane dense)
    """
    S = H * W
    w = w_ref[...].astype(jnp.float32)                            # (9, C)

    # Hoisted invariants, reused across the unrolled batch loop.
    col = jax.lax.broadcasted_iota(jnp.int32, (1, S), 1) % W
    mask_l = col == 0              # fixup lanes for column offset q = -1
    mask_r = col == (W - 1)        # fixup lanes for column offset q = +1
    bias_row = jnp.full((1, S), b_ref[0], jnp.float32)

    for n in range(Nb):
        x_n = x_ref[n].astype(jnp.float32)                        # (C, S)
        # Per-tap channel reduction on the MXU: y[t, s] = sum_c w[t, c] * x[c, s]
        y = jnp.dot(w, x_n, preferred_element_type=jnp.float32)   # (9, S)

        # out[h, w] = b + sum_{dy,dx} y[3*dy+dx, (h+dy-1)%H, (w+dx-1)%W]
        # Row shifts (r = dy-1) are exact flat lane rolls by ±W.  The single
        # flat column roll per q = dx-1 is wrong only at one boundary column
        # and is patched with a second roll + masked select.
        acc = bias_row
        for q in (-1, 0, 1):
            rq = None
            for r in (-1, 0, 1):
                t = 3 * (r + 1) + (q + 1)
                yt = y[t:t + 1, :]                                # (1, S)
                if r != 0:
                    yt = pltpu.roll(yt, (-r * W) % S, axis=1)
                rq = yt if rq is None else rq + yt
            if q == 0:
                acc = acc + rq
            else:
                main = pltpu.roll(rq, (-q) % S, axis=1)
                fix = pltpu.roll(rq, (q * (W - 1)) % S, axis=1)
                mask = mask_r if q == 1 else mask_l
                acc = acc + jnp.where(mask, fix, main)

        o_ref[pl.ds(n, 1), :] = acc.astype(o_ref.dtype)


def _pick_batch_block(N, C, S, itemsize=4):
    """Batch elements per grid step: v7x-safe VMEM, sublane-aligned output."""
    budget = 24 * 1024 * 1024                        # double-buffered working-set cap
    per_elem = C * S * itemsize
    cap = max(8, min(32, budget // (2 * per_elem)))  # 32 also keeps the unrolled trace modest
    if N <= cap:
        return N                                     # one fat step holds the whole batch
    nb = (cap // 8) * 8                              # multiple of 8 -> aligned (Nb, S) stores
    # Prefer an even number of grid steps so both v7x TensorCores stay busy.
    for cand in range(nb, 7, -8):
        if ((N + cand - 1) // cand) % 2 == 0:
            return cand
    return nb


def periodic_qhead(x_nchw, weight_oihw, bias):
    """PeriodicQHead forward.

    x_nchw:      (N, 64, H, W)  float32  (PyTorch NCHW layout)
    weight_oihw: (1, 64, 3, 3)  float32  (PyTorch OIHW layout)
    bias:        (1,)           float32
    returns:     (N, H, W)      float32  (conv output with channel squeezed)
    """
    N, C, H, W = x_nchw.shape
    S = H * W
    Nb = _pick_batch_block(N, C, S, np.dtype(x_nchw.dtype).itemsize)

    # Free reshape of the contiguous NCHW tensor — activations cross HBM once.
    x_flat = x_nchw.reshape(N, C, S)
    # Tiny weight relayout: (1, C, 3, 3) -> (3, 3, C) -> (9, C), row t = 3*dy+dx.
    w_taps = jnp.transpose(weight_oihw[0], (1, 2, 0)).reshape(9, C)

    out = pl.pallas_call(
        functools.partial(_periodic_qhead_kernel, H=H, W=W, Nb=Nb),
        out_shape=jax.ShapeDtypeStruct((N, S), x_nchw.dtype),
        grid_spec=pltpu.PrefetchScalarGridSpec(
            num_scalar_prefetch=0,
            grid=(pl.cdiv(N, Nb),),
            in_specs=[
                # Nb batch elements of activations per step.
                pl.BlockSpec((Nb, C, S), lambda i: (i, 0, 0)),
                # Full (tiny) weight, resident across all grid steps.
                pl.BlockSpec((9, C), lambda i: (0, 0)),
                # Scalar bias lives in SMEM.
                pl.BlockSpec(memory_space=pltpu.MemorySpace.SMEM),
            ],
            # Sublane+lane dense output block -> unmasked stores, fat writeback DMA.
            out_specs=pl.BlockSpec((Nb, S), lambda i: (i, 0)),
        ),
        compiler_params=pltpu.CompilerParams(
            dimension_semantics=("parallel",),
            vmem_limit_bytes=32 * 1024 * 1024,
        ),
    )(x_flat, w_taps, bias)

    return out.reshape(N, H, W)


def _reference(x_nchw, weight_oihw, bias):
    """Pure-JAX reference: circular pad + VALID conv (matches PyTorch Conv2d)."""
    xp = jnp.pad(x_nchw, ((0, 0), (0, 0), (1, 1), (1, 1)), mode="wrap")
    out = jax.lax.conv_general_dilated(
        xp, weight_oihw, window_strides=(1, 1), padding="VALID",
        dimension_numbers=("NCHW", "OIHW", "NCHW"),
    )
    out = out + bias.reshape(1, 1, 1, 1)
    return out[:, 0]  # squeeze(1)


if __name__ == "__main__":
    key = jax.random.PRNGKey(0)
    k_x, k_w, k_b = jax.random.split(key, 3)

    N, C, H, W = 2, 64, 16, 16   # Conv2d in_channels=64 fixed by the module
    x = jax.random.normal(k_x, (N, C, H, W), dtype=jnp.float32)

    # PyTorch-Conv2d-style uniform init: U(-1/sqrt(fan_in), 1/sqrt(fan_in))
    fan_in = C * 3 * 3
    bound = 1.0 / float(np.sqrt(fan_in))
    weight = jax.random.uniform(k_w, (1, C, 3, 3), jnp.float32, -bound, bound)
    bias = jax.random.uniform(k_b, (1,), jnp.float32, -bound, bound)

    out = jax.block_until_ready(periodic_qhead(x, weight, bias))
    assert out.shape == (N, H, W), out.shape

    ref = _reference(x, weight, bias)
    np.testing.assert_allclose(np.asarray(out), np.asarray(ref), rtol=1e-4, atol=1e-4)

    print("KERNEL_OK")
</pallas_src>

<mosaic_0001>
module attributes {stable_mosaic.version = 11 : i64} {
  func.func @_periodic_qhead_kernel(%arg0: i32, %arg1: memref<2x64x256xf32, #tpu.memory_space<vmem>>, %arg2: memref<9x64xf32, #tpu.memory_space<vmem>>, %arg3: memref<1xf32, #tpu.memory_space<smem>>, %arg4: memref<2x256xf32, #tpu.memory_space<vmem>>) attributes {dimension_semantics = [#tpu.dimension_semantics<parallel>], iteration_bounds = array<i64: 1>, scalar_prefetch = 0 : i64, scratch_operands = 0 : i64, tpu.core_type = #tpu.core_type<tc>, window_params = [{transform_indices = @transform_0, window_bounds = array<i64: 2, 64, 256>}, {pipeline_mode = #tpu.pipeline_mode<synchronous>, transform_indices = @transform_1, window_bounds = array<i64: 9, 64>}, {transform_indices = @transform_2, window_bounds = array<i64: 1>}, {transform_indices = @transform_3, window_bounds = array<i64: 2, 256>}]} {
    %c0 = arith.constant 0 : index
    %c0_0 = arith.constant 0 : index
    %0 = vector.load %arg2[%c0, %c0_0] : memref<9x64xf32, #tpu.memory_space<vmem>>, vector<9x64xf32>
    %1 = tpu.iota {dimensions = array<i32: 1>} : vector<1x256xi32>
    %c16_i32 = arith.constant 16 : i32
    %c0_i32 = arith.constant 0 : i32
    %2 = arith.cmpi eq, %c16_i32, %c0_i32 : i32
    %c1_i32 = arith.constant 1 : i32
    %3 = arith.select %2, %c1_i32, %c16_i32 : i32
    %4 = vector.broadcast %3 : i32 to vector<1x256xi32>
    %5 = arith.remsi %1, %4 : vector<1x256xi32>
    %c0_i32_1 = arith.constant 0 : i32
    %6 = vector.broadcast %c0_i32_1 : i32 to vector<1x256xi32>
    %7 = arith.cmpi ne, %5, %6 : vector<1x256xi32>
    %c0_i32_2 = arith.constant 0 : i32
    %8 = vector.broadcast %c0_i32_2 : i32 to vector<1x256xi32>
    %9 = arith.cmpi slt, %5, %8 : vector<1x256xi32>
    %c0_i32_3 = arith.constant 0 : i32
    %10 = arith.cmpi slt, %3, %c0_i32_3 : i32
    %11 = vector.broadcast %10 : i1 to vector<1x256xi1>
    %12 = vector.broadcast %11 : vector<1x256xi1> to vector<1x256xi1>
    %13 = arith.xori %9, %12 : vector<1x256xi1>
    %14 = arith.andi %13, %7 : vector<1x256xi1>
    %15 = vector.broadcast %3 : i32 to vector<1x256xi32>
    %16 = arith.addi %5, %15 : vector<1x256xi32>
    %17 = arith.select %14, %16, %5 : vector<1x256xi1>, vector<1x256xi32>
    %c0_i32_4 = arith.constant 0 : i32
    %18 = vector.broadcast %c0_i32_4 : i32 to vector<1x256xi32>
    %19 = arith.cmpi eq, %17, %18 : vector<1x256xi32>
    %c15_i32 = arith.constant 15 : i32
    %20 = vector.broadcast %c15_i32 : i32 to vector<1x256xi32>
    %21 = arith.cmpi eq, %17, %20 : vector<1x256xi32>
    %c0_5 = arith.constant 0 : index
    %22 = memref.load %arg3[%c0_5] : memref<1xf32, #tpu.memory_space<smem>>
    %23 = vector.broadcast %22 : f32 to vector<1x256xf32>
    %c0_6 = arith.constant 0 : index
    %c0_7 = arith.constant 0 : index
    %c0_8 = arith.constant 0 : index
    %24 = vector.load %arg1[%c0_6, %c0_7, %c0_8] : memref<2x64x256xf32, #tpu.memory_space<vmem>>, vector<1x64x256xf32>
    %25 = vector.shape_cast %24 : vector<1x64x256xf32> to vector<64x256xf32>
    %cst = arith.constant dense<0.000000e+00> : vector<9x256xf32>
    %26 = tpu.matmul %0, %25, %cst {dimension_numbers = #tpu.dot_dimension_numbers<[1], [0], [0], [1], [0, 0, 1, 1], [], []>} : vector<9x64xf32>, vector<64x256xf32>, vector<9x256xf32> -> vector<9x256xf32>
    %27 = vector.extract_strided_slice %26 {offsets = [0, 0], sizes = [1, 256], strides = [1, 1]} : vector<9x256xf32> to vector<1x256xf32>
    %c16_i32_9 = arith.constant 16 : i32
    %28 = tpu.dynamic_rotate %27 by %c16_i32_9 dim 1 : vector<1x256xf32>, i32 -> vector<1x256xf32>
    %29 = vector.extract_strided_slice %26 {offsets = [3, 0], sizes = [1, 256], strides = [1, 1]} : vector<9x256xf32> to vector<1x256xf32>
    %30 = arith.addf %28, %29 : vector<1x256xf32>
    %31 = vector.extract_strided_slice %26 {offsets = [6, 0], sizes = [1, 256], strides = [1, 1]} : vector<9x256xf32> to vector<1x256xf32>
    %c240_i32 = arith.constant 240 : i32
    %32 = tpu.dynamic_rotate %31 by %c240_i32 dim 1 : vector<1x256xf32>, i32 -> vector<1x256xf32>
    %33 = arith.addf %30, %32 : vector<1x256xf32>
    %c1_i32_10 = arith.constant 1 : i32
    %34 = tpu.dynamic_rotate %33 by %c1_i32_10 dim 1 : vector<1x256xf32>, i32 -> vector<1x256xf32>
    %c241_i32 = arith.constant 241 : i32
    %35 = tpu.dynamic_rotate %33 by %c241_i32 dim 1 : vector<1x256xf32>, i32 -> vector<1x256xf32>
    %36 = arith.select %19, %35, %34 : vector<1x256xi1>, vector<1x256xf32>
    %37 = arith.addf %23, %36 : vector<1x256xf32>
    %38 = vector.extract_strided_slice %26 {offsets = [1, 0], sizes = [1, 256], strides = [1, 1]} : vector<9x256xf32> to vector<1x256xf32>
    %c16_i32_11 = arith.constant 16 : i32
    %39 = tpu.dynamic_rotate %38 by %c16_i32_11 dim 1 : vector<1x256xf32>, i32 -> vector<1x256xf32>
    %40 = vector.extract_strided_slice %26 {offsets = [4, 0], sizes = [1, 256], strides = [1, 1]} : vector<9x256xf32> to vector<1x256xf32>
    %41 = arith.addf %39, %40 : vector<1x256xf32>
    %42 = vector.extract_strided_slice %26 {offsets = [7, 0], sizes = [1, 256], strides = [1, 1]} : vector<9x256xf32> to vector<1x256xf32>
    %c240_i32_12 = arith.constant 240 : i32
    %43 = tpu.dynamic_rotate %42 by %c240_i32_12 dim 1 : vector<1x256xf32>, i32 -> vector<1x256xf32>
    %44 = arith.addf %41, %43 : vector<1x256xf32>
    %45 = arith.addf %37, %44 : vector<1x256xf32>
    %46 = vector.extract_strided_slice %26 {offsets = [2, 0], sizes = [1, 256], strides = [1, 1]} : vector<9x256xf32> to vector<1x256xf32>
    %c16_i32_13 = arith.constant 16 : i32
    %47 = tpu.dynamic_rotate %46 by %c16_i32_13 dim 1 : vector<1x256xf32>, i32 -> vector<1x256xf32>
    %48 = vector.extract_strided_slice %26 {offsets = [5, 0], sizes = [1, 256], strides = [1, 1]} : vector<9x256xf32> to vector<1x256xf32>
    %49 = arith.addf %47, %48 : vector<1x256xf32>
    %50 = vector.extract_strided_slice %26 {offsets = [8, 0], sizes = [1, 256], strides = [1, 1]} : vector<9x256xf32> to vector<1x256xf32>
    %c240_i32_14 = arith.constant 240 : i32
    %51 = tpu.dynamic_rotate %50 by %c240_i32_14 dim 1 : vector<1x256xf32>, i32 -> vector<1x256xf32>
    %52 = arith.addf %49, %51 : vector<1x256xf32>
    %c255_i32 = arith.constant 255 : i32
    %53 = tpu.dynamic_rotate %52 by %c255_i32 dim 1 : vector<1x256xf32>, i32 -> vector<1x256xf32>
    %c15_i32_15 = arith.constant 15 : i32
    %54 = tpu.dynamic_rotate %52 by %c15_i32_15 dim 1 : vector<1x256xf32>, i32 -> vector<1x256xf32>
    %55 = arith.select %21, %54, %53 : vector<1x256xi1>, vector<1x256xf32>
    %56 = arith.addf %45, %55 : vector<1x256xf32>
    %c0_16 = arith.constant 0 : index
    %c0_17 = arith.constant 0 : index
    %57 = vector.load %arg4[%c0_16, %c0_17] : memref<2x256xf32, #tpu.memory_space<vmem>>, vector<1x256xf32>
    tpu.vector_store %arg4[%c0_16, %c0_17], %56 {strides = array<i32>} : memref<2x256xf32, #tpu.memory_space<vmem>>, vector<1x256xf32>,
    %c1 = arith.constant 1 : index
    %c0_18 = arith.constant 0 : index
    %c0_19 = arith.constant 0 : index
    %58 = vector.load %arg1[%c1, %c0_18, %c0_19] : memref<2x64x256xf32, #tpu.memory_space<vmem>>, vector<1x64x256xf32>
    %59 = vector.shape_cast %58 : vector<1x64x256xf32> to vector<64x256xf32>
    %cst_20 = arith.constant dense<0.000000e+00> : vector<9x256xf32>
    %60 = tpu.matmul %0, %59, %cst_20 {dimension_numbers = #tpu.dot_dimension_numbers<[1], [0], [0], [1], [0, 0, 1, 1], [], []>} : vector<9x64xf32>, vector<64x256xf32>, vector<9x256xf32> -> vector<9x256xf32>
    %61 = vector.extract_strided_slice %60 {offsets = [0, 0], sizes = [1, 256], strides = [1, 1]} : vector<9x256xf32> to vector<1x256xf32>
    %c16_i32_21 = arith.constant 16 : i32
    %62 = tpu.dynamic_rotate %61 by %c16_i32_21 dim 1 : vector<1x256xf32>, i32 -> vector<1x256xf32>
    %63 = vector.extract_strided_slice %60 {offsets = [3, 0], sizes = [1, 256], strides = [1, 1]} : vector<9x256xf32> to vector<1x256xf32>
    %64 = arith.addf %62, %63 : vector<1x256xf32>
    %65 = vector.extract_strided_slice %60 {offsets = [6, 0], sizes = [1, 256], strides = [1, 1]} : vector<9x256xf32> to vector<1x256xf32>
    %c240_i32_22 = arith.constant 240 : i32
    %66 = tpu.dynamic_rotate %65 by %c240_i32_22 dim 1 : vector<1x256xf32>, i32 -> vector<1x256xf32>
    %67 = arith.addf %64, %66 : vector<1x256xf32>
    %c1_i32_23 = arith.constant 1 : i32
    %68 = tpu.dynamic_rotate %67 by %c1_i32_23 dim 1 : vector<1x256xf32>, i32 -> vector<1x256xf32>
    %c241_i32_24 = arith.constant 241 : i32
    %69 = tpu.dynamic_rotate %67 by %c241_i32_24 dim 1 : vector<1x256xf32>, i32 -> vector<1x256xf32>
    %70 = arith.select %19, %69, %68 : vector<1x256xi1>, vector<1x256xf32>
    %71 = arith.addf %23, %70 : vector<1x256xf32>
    %72 = vector.extract_strided_slice %60 {offsets = [1, 0], sizes = [1, 256], strides = [1, 1]} : vector<9x256xf32> to vector<1x256xf32>
    %c16_i32_25 = arith.constant 16 : i32
    %73 = tpu.dynamic_rotate %72 by %c16_i32_25 dim 1 : vector<1x256xf32>, i32 -> vector<1x256xf32>
    %74 = vector.extract_strided_slice %60 {offsets = [4, 0], sizes = [1, 256], strides = [1, 1]} : vector<9x256xf32> to vector<1x256xf32>
    %75 = arith.addf %73, %74 : vector<1x256xf32>
    %76 = vector.extract_strided_slice %60 {offsets = [7, 0], sizes = [1, 256], strides = [1, 1]} : vector<9x256xf32> to vector<1x256xf32>
    %c240_i32_26 = arith.constant 240 : i32
    %77 = tpu.dynamic_rotate %76 by %c240_i32_26 dim 1 : vector<1x256xf32>, i32 -> vector<1x256xf32>
    %78 = arith.addf %75, %77 : vector<1x256xf32>
    %79 = arith.addf %71, %78 : vector<1x256xf32>
    %80 = vector.extract_strided_slice %60 {offsets = [2, 0], sizes = [1, 256], strides = [1, 1]} : vector<9x256xf32> to vector<1x256xf32>
    %c16_i32_27 = arith.constant 16 : i32
    %81 = tpu.dynamic_rotate %80 by %c16_i32_27 dim 1 : vector<1x256xf32>, i32 -> vector<1x256xf32>
    %82 = vector.extract_strided_slice %60 {offsets = [5, 0], sizes = [1, 256], strides = [1, 1]} : vector<9x256xf32> to vector<1x256xf32>
    %83 = arith.addf %81, %82 : vector<1x256xf32>
    %84 = vector.extract_strided_slice %60 {offsets = [8, 0], sizes = [1, 256], strides = [1, 1]} : vector<9x256xf32> to vector<1x256xf32>
    %c240_i32_28 = arith.constant 240 : i32
    %85 = tpu.dynamic_rotate %84 by %c240_i32_28 dim 1 : vector<1x256xf32>, i32 -> vector<1x256xf32>
    %86 = arith.addf %83, %85 : vector<1x256xf32>
    %c255_i32_29 = arith.constant 255 : i32
    %87 = tpu.dynamic_rotate %86 by %c255_i32_29 dim 1 : vector<1x256xf32>, i32 -> vector<1x256xf32>
    %c15_i32_30 = arith.constant 15 : i32
    %88 = tpu.dynamic_rotate %86 by %c15_i32_30 dim 1 : vector<1x256xf32>, i32 -> vector<1x256xf32>
    %89 = arith.select %21, %88, %87 : vector<1x256xi1>, vector<1x256xf32>
    %90 = arith.addf %79, %89 : vector<1x256xf32>
    %c1_31 = arith.constant 1 : index
    %c0_32 = arith.constant 0 : index
    %91 = vector.load %arg4[%c1_31, %c0_32] : memref<2x256xf32, #tpu.memory_space<vmem>>, vector<1x256xf32>
    tpu.vector_store %arg4[%c1_31, %c0_32], %90 {strides = array<i32>} : memref<2x256xf32, #tpu.memory_space<vmem>>, vector<1x256xf32>,
    return
  }
  func.func @transform_0(%arg0: i32) -> (i32, i32, i32) {
    %c0_i32 = arith.constant 0 : i32
    %c0_i32_0 = arith.constant 0 : i32
    %c0_i32_1 = arith.constant 0 : i32
    return %arg0, %c0_i32, %c0_i32_0 : i32, i32, i32
  }
  func.func @transform_1(%arg0: i32) -> (i32, i32) {
    %c0_i32 = arith.constant 0 : i32
    %c0_i32_0 = arith.constant 0 : i32
    %c0_i32_1 = arith.constant 0 : i32
    return %c0_i32, %c0_i32_0 : i32, i32
  }
  func.func @transform_2(%arg0: i32) -> i32 {
    %c0_i32 = arith.constant 0 : i32
    %c0_i32_0 = arith.constant 0 : i32
    return %c0_i32 : i32
  }
  func.func @transform_3(%arg0: i32) -> (i32, i32) {
    %c0_i32 = arith.constant 0 : i32
    %c0_i32_0 = arith.constant 0 : i32
    return %arg0, %c0_i32 : i32, i32
  }
}

</mosaic_0001>

<bundles_post_ra>
// kernel: tpu_custom_call.1
= control target key start
LH: loop header
LB: loop body
LE: loop exit
PB: predicated region body
PF: predicated region fallthrough
CT: control target
= control target key end

     0   :  { %9 = vsyncpa [#allocation4], 0  ;;  %s965_s0 = inlined_call_operand.hbm [shape: f32[2,64,256], index: 0, kind: input, shape index: {}]   ;;  %s966_s1 = inlined_call_operand.hbm [shape: f32[9,64], index: 1, kind: input, shape index: {}]   ;;  %s967_s2 = inlined_call_operand.<no memory space> [shape: f32[1], index: 2, kind: input, shape index: {}]   ;;  %s968_s3 = inlined_call_operand.hbm [shape: f32[2,256], index: 3, kind: output, shape index: {}]  }
   0x1   :  { %10 = vsyncpa [#allocation7], 0 }
   0x2   :  { %11 = vsyncpa [#allocation5], 0  ;;  %s684_s12 = smov [#allocation3]   ;;  %s612_s16 = scalar_lea.hbm %s965_s0, 4096 }
   0x3   :  { %s17_s13 = sshll.u32 %s684_s12, 4  ;;  %p613_p0 = scmp.ne.s32.totalorder %s965_s0, %s612_s16  ;;  %s18_s13 = int_to_ptr.vmem [resolvable:$true] %s17_s13 }
   0x4   :  { %p616_p1 = scmp.lt.u32.totalorder %s612_s16, %s965_s0 }
   0x6   :  { %p618_p2 = pnand %p616_p1, %p613_p0 }
   0x8   :  { %621 = shalt.err (!%p618_p2)
}
   0x9   :  { %s622_s21 = scalar_lea.vmem %s18_s13, 4096  ;;  %p627_p4 = scmp.lt.s32.totalorder %s18_s13, %s18_s13 }
   0xa   :  { %p623_p3 = scmp.ne.s32.totalorder %s18_s13, %s622_s21  ;;  %p628_p5 = scmp.lt.s32.totalorder %s622_s21, %s622_s21 }
   0xc   :  { %p629_p6 = por %p628_p5, %p627_p4 }
   0xe   :  { %p630_p7 = pnand %p629_p6, %p623_p3 }
  0x10   :  { %633 = shalt.err (!%p630_p7)
}
  0x11   :  { %s685_s22 = smov 256   ;;  %s686_s23 = smov 16  }
  0x12   :  { %23 = dma.hbm_to_vmem [thread:$0]  %s965_s0, 4096, %s18_s13, [#allocation4], %s685_s22, %s685_s22, %s686_s23  }
  0x13   :  { %s687_s26 = smov [#allocation6]   ;;  %s634_s30 = scalar_lea.hbm %s966_s1, 256 }
  0x14   :  { %s29_s27 = sshll.u32 %s687_s26, 4  ;;  %p635_p8 = scmp.ne.s32.totalorder %s966_s1, %s634_s30  ;;  %s30_s27 = int_to_ptr.vmem [resolvable:$true] %s29_s27 }
  0x15   :  { %p638_p9 = scmp.lt.u32.totalorder %s634_s30, %s966_s1 }
  0x17   :  { %p640_p10 = pnand %p638_p9, %p635_p8 }
  0x19   :  { %643 = shalt.err (!%p640_p10)
}
  0x1a   :  { %s644_s8 = scalar_lea.vmem %s30_s27, 256  ;;  %p649_p12 = scmp.lt.s32.totalorder %s30_s27, %s30_s27 }
  0x1b   :  { %p645_p11 = scmp.ne.s32.totalorder %s30_s27, %s644_s8  ;;  %p650_p13 = scmp.lt.s32.totalorder %s644_s8, %s644_s8 }
  0x1d   :  { %p651_p0 = por %p650_p13, %p649_p12 }
  0x1f   :  { %p652_p1 = pnand %p651_p0, %p645_p11 }
  0x21   :  { %655 = shalt.err (!%p652_p1)
}
  0x22   :  { %s688_s0 = smov 128   ;;  %s689_s9 = smov 8  }
  0x23   :  { %35 = dma.hbm_to_vmem [thread:$0]  %s966_s1, 256, %s30_s27, [#allocation7], %s688_s0, %s688_s0, %s689_s9  }
  0x24   :  { %678 = dma.done.wait [#allocation4], 4096  }
  0x25   :  { %679 = vsyncadd [#allocation4], 4294963200 }
  0x26   :  { %680 = dma.done.wait [#allocation7], 256  }
  0x27   :  { %681 = vsyncadd [#allocation7], 4294967040  ;;  %v690_v0 = vmov 0.0   ;;  %v80_v1 = vld [vmem:[#allocation3 + $0x8] sm:$0xff]  ;;  %v82_v2 = vld [vmem:[#allocation3 + $0x18] sm:$0xff]  ;;  %vm95_vm0 = vcmask 523264  }
  0x28   :  { %166 = vmatprep.mubr.f32.mxu0 %v690_v0  ;;  %401 = vmatprep.mubr.f32.mxu1 %v690_v0  ;;  %v322_v3 = vld [vmem:[#allocation3 + $0x88] sm:$0xff]  ;;  %v566_v4 = vpack.c.bf16 %v82_v2, %v80_v1  ;;  %v324_v5 = vld [vmem:[#allocation3 + $0x98] sm:$0xff]  ;;  %v79_v6 = vld [vmem:[#allocation3] sm:$0xff]  ;;  %s691_s1 = smov 112   ;;  %s692_s12 = smov 1  }
  0x29   :  { %v81_v7 = vld [vmem:[#allocation3 + $0x10] sm:$0xff]  ;;  %v582_v8 = vpack.c.bf16 %v324_v5, %v322_v3  ;;  %v321_v10 = vld [vmem:[#allocation3 + $0x80] sm:$0xff]  ;;  %v84_v12 = vld [vmem:[#allocation3 + $0x28] sm:$0xff]  ;;  %s693_s13 = smov 113   ;;  %s694_s14 = smov 127  }
  0x2a   :  { %v568_v9 = vpack.c.bf16 %v81_v7, %v79_v6  ;;  %v323_v11 = vld [vmem:[#allocation3 + $0x90] sm:$0xff]  ;;  %567 = vmatprep.subr.bf16.mxu0 %v566_v4  ;;  %v86_v14 = vld [vmem:[#allocation3 + $0x38] sm:$0xff]  ;;  %v326_v15 = vld [vmem:[#allocation3 + $0xa8] sm:$0xff]  ;;  %s695_s15 = smov 15  }
  0x2b   :  { %v584_v13 = vpack.c.bf16 %v323_v11, %v321_v10  ;;  %v328_v16 = vld [vmem:[#allocation3 + $0xb8] sm:$0xff]  ;;  %583 = vmatprep.subr.bf16.mxu1 %v582_v8  ;;  %v570_v17 = vpack.c.bf16 %v86_v14, %v84_v12  ;;  %v83_v19 = vld [vmem:[#allocation3 + $0x20] sm:$0xff]  ;;  %v85_v20 = vld [vmem:[#allocation3 + $0x30] sm:$0xff]  ;;  %v46_v11 = vlaneseq }
  0x2c   :  { %569 = vmatpush1.bf16.msra.mxu0 %v568_v9  ;;  %v586_v18 = vpack.c.bf16 %v328_v16, %v326_v15  ;;  %v325_v21 = vld [vmem:[#allocation3 + $0xa0] sm:$0xff]  ;;  %v572_v22 = vpack.c.bf16 %v85_v20, %v83_v19  ;;  %v327_v23 = vld [vmem:[#allocation3 + $0xb0] sm:$0xff]  ;;  %v88_v24 = vld [vmem:[#allocation3 + $0x48] sm:$0xff] }
  0x2d   :  { %585 = vmatpush1.bf16.msra.mxu1 %v584_v13  ;;  %v90_v25 = vld [vmem:[#allocation3 + $0x58] sm:$0xff]  ;;  %571 = vmatprep.subr.bf16.mxu0 %v570_v17  ;;  %v588_v26 = vpack.c.bf16 %v327_v23, %v325_v21  ;;  %v330_v28 = vld [vmem:[#allocation3 + $0xc8] sm:$0xff]  ;;  %v87_v30 = vld [vmem:[#allocation3 + $0x40] sm:$0xff]  ;;  %v800_v12 = vand.u32 127, %v46_v11  ;;  %vm935_vm11 = vcmp.lt.s32.totalorder %v46_v11, 256 }
  0x2e   :  { %587 = vmatprep.subr.bf16.mxu1 %v586_v18  ;;  %v574_v27 = vpack.c.bf16 %v90_v25, %v88_v24  ;;  %v332_v29 = vld [vmem:[#allocation3 + $0xd8] sm:$0xff]  ;;  %v89_v32 = vld [vmem:[#allocation3 + $0x50] sm:$0xff]  ;;  %v329_v33 = vld [vmem:[#allocation3 + $0xc0] sm:$0xff] }
  0x2f   :  { %v590_v31 = vpack.c.bf16 %v332_v29, %v330_v28  ;;  %v331_v34 = vld [vmem:[#allocation3 + $0xd0] sm:$0xff]  ;;  %v576_v35 = vpack.c.bf16 %v89_v32, %v87_v30  ;;  %v92_v36 = vld [vmem:[#allocation3 + $0x68] sm:$0xff]  ;;  %v94_v37 = vld [vmem:[#allocation3 + $0x78] sm:$0xff]  ;;  %vm183_vm1 = vcmp.lt.s32.totalorder %v800_v12, 16  ;;  %vm202_vm2 = vcmp.lt.s32.totalorder %v800_v12, 112 }
  0x30   :  { %573 = vmatpush1.bf16.msra.mxu0 %v572_v22  ;;  %v334_v38 = vld [vmem:[#allocation3 + $0xe8] sm:$0xff]  ;;  %v592_v39 = vpack.c.bf16 %v331_v34, %v329_v33  ;;  %v578_v40 = vpack.c.bf16 %v94_v37, %v92_v36  ;;  %v336_v41 = vld [vmem:[#allocation3 + $0xf8] sm:$0xff]  ;;  %v91_v42 = vld [vmem:[#allocation3 + $0x60] sm:$0xff]  ;;  %vm218_vm3 = vcmp.lt.s32.totalorder %v800_v12, 113  ;;  %vm211_vm4 = vcmp.lt.s32.totalorder %v800_v12, 1 }
  0x31   :  { %589 = vmatpush1.bf16.msra.mxu1 %v588_v26  ;;  %575 = vmatprep.subr.bf16.mxu0 %v574_v27  ;;  %v93_v43 = vld [vmem:[#allocation3 + $0x70] sm:$0xff]  ;;  %v594_v44 = vpack.c.bf16 %v336_v41, %v334_v38  ;;  %v333_v45 = vld [vmem:[#allocation3 + $0xe0] sm:$0xff]  ;;  %v45_v50 = vld [vmem:[#allocation6 + $0x8] sm:$0x1]  ;;  %vm283_vm7 = vcmp.lt.s32.totalorder %v800_v12, 127  ;;  %vm290_vm10 = vcmp.lt.s32.totalorder %v800_v12, 15 }
  0x32   :  { %591 = vmatprep.subr.bf16.mxu1 %v590_v31  ;;  %v335_v46 = vld [vmem:[#allocation3 + $0xf0] sm:$0xff]  ;;  %v580_v47 = vpack.c.bf16 %v93_v43, %v91_v42  ;;  %v44_v49 = vld [vmem:[#allocation6] sm:$0xff] }
  0x33   :  { %v596_v48 = vpack.c.bf16 %v335_v46, %v333_v45 }
  0x34   :  { %577 = vmatpush1.bf16.msra.mxu0 %v576_v35 }
  0x35   :  { %593 = vmatpush1.bf16.msra.mxu1 %v592_v39  ;;  %579 = vmatprep.subr.bf16.mxu0 %v578_v40 }
  0x36   :  { %595 = vmatprep.subr.bf16.mxu1 %v594_v44 }
  0x38   :  { %581 = vmatpush1.bf16.msra.mxu0 %v580_v47 }
  0x39   :  { %597 = vmatpush1.bf16.msra.mxu1 %v596_v48 }
  0x3b   :  { %562 = vmatmul.mubr.msk.f32.vlgmr.msra.gmra.mrb[0].mxu0 %vm95_vm0, %v44_v49 }
  0x3c   :  { %564 = vmatmul.mubr.msk.f32.vlgmr.msra.gmra.mrb[0].mxu1 %vm95_vm0, %v44_v49  ;;  %172 = vmatprep.mubr.f32.mxu0 %v690_v0 }
  0x3d   :  { %407 = vmatprep.mubr.f32.mxu1 %v690_v0 }
  0x3f   :  { %563 = vmatmul.mubr.msk.f32.gmra.mrb[2].mxu0 %vm95_vm0, %v45_v50 }
  0x40   :  { %565 = vmatmul.mubr.msk.f32.gmra.mrb[2].mxu1 %vm95_vm0, %v45_v50 }
 0x10e   :  { %v747_v51 = vpop.f32.mrb[0].mxu0 }
 0x10f   :  { %v749_v52 = vpop.f32.mrb[0].mxu1  ;;  %179 = vrot.lane.b32.xlu0 %v747_v51, %s686_s23  ;;  %v753_v53 = vpop.f32.mrb[1].mxu0  ;;  %v194_v59 = vrot.slane %v747_v51, 6  ;;  %v255_v63 = vrot.slane %v747_v51, 2  ;;  %v225_v3 = vrot.slane %v747_v51, 1  ;;  %v241_v7 = vrot.slane %v747_v51, 7 }
 0x110   :  { %414 = vrot.lane.b32.xlu1 %v749_v52, %s686_s23  ;;  %v757_v54 = vpop.f32.mrb[1].mxu1  ;;  %v195_v60 = vrot.slane %v753_v53, 6  ;;  %v428_v61 = vrot.slane %v749_v52, 6  ;;  %v256_v0 = vrot.slane %v753_v53, 2  ;;  %v486_v1 = vrot.slane %v749_v52, 2 }
 0x111   :  { %v429_v62 = vrot.slane %v757_v54, 6  ;;  %v487_v2 = vrot.slane %v757_v54, 2  ;;  %v226_v4 = vrot.slane %v753_v53, 1  ;;  %v456_v5 = vrot.slane %v749_v52, 1 }
 0x112   :  { %v174_v55 = vpop.f32.mrb[2].mxu0  ;;  %v457_v6 = vrot.slane %v757_v54, 1  ;;  %v242_v8 = vrot.slane %v753_v53, 7  ;;  %v472_v9 = vrot.slane %v749_v52, 7  ;;  %v473_v10 = vrot.slane %v757_v54, 7 }
 0x113   :  { %181 = vrot.lane.b32.xlu0 %v753_v53, %s686_s23  ;;  %v176_v56 = vpop.f32.mrb[3].mxu0  ;;  %v409_v57 = vpop.f32.mrb[2].mxu1  ;;  %v188_v19 = vrot.slane %v747_v51, 3  ;;  %v189_v20 = vrot.slane %v753_v53, 3  ;;  %v422_v33 = vrot.slane %v749_v52, 3  ;;  %v423_v34 = vrot.slane %v757_v54, 3 }
 0x114   :  { %416 = vrot.lane.b32.xlu1 %v757_v54, %s686_s23  ;;  %v411_v58 = vpop.f32.mrb[3].mxu1  ;;  %v265_v47 = vrot.slane %v747_v51, 5  ;;  %v266_v48 = vrot.slane %v753_v53, 5 }
 0x117   :  { %198 = vrot.lane.b32.xlu0 %v194_v59, %s691_s1 }
 0x118   :  { %200 = vrot.lane.b32.xlu1 %v195_v60, %s691_s1 }
 0x11b   :  { %432 = vrot.lane.b32.xlu0 %v428_v61, %s691_s1 }
 0x11c   :  { %434 = vrot.lane.b32.xlu1 %v429_v62, %s691_s1 }
 0x11f   :  { %259 = vrot.lane.b32.xlu0 %v255_v63, %s686_s23 }
 0x120   :  { %261 = vrot.lane.b32.xlu1 %v256_v0, %s686_s23 }
 0x123   :  { %490 = vrot.lane.b32.xlu0 %v486_v1, %s686_s23  ;;  %v496_v1 = vrot.slane %v749_v52, 5 }
 0x124   :  { %492 = vrot.lane.b32.xlu1 %v487_v2, %s686_s23  ;;  %v497_v2 = vrot.slane %v757_v54, 5 }
 0x127   :  { %271 = vrot.lane.b32.xlu0 %v174_v55, %s691_s1 }
 0x128   :  { %273 = vrot.lane.b32.xlu1 %v176_v56, %s691_s1 }
 0x12b   :  { %502 = vrot.lane.b32.xlu0 %v409_v57, %s691_s1 }
 0x12c   :  { %504 = vrot.lane.b32.xlu1 %v411_v58, %s691_s1 }
 0x12f   :  { %229 = vrot.lane.b32.xlu0 %v225_v3, %s686_s23 }
 0x130   :  { %231 = vrot.lane.b32.xlu1 %v226_v4, %s686_s23 }
 0x133   :  { %460 = vrot.lane.b32.xlu0 %v456_v5, %s686_s23 }
 0x134   :  { %462 = vrot.lane.b32.xlu1 %v457_v6, %s686_s23 }
 0x137   :  { %245 = vrot.lane.b32.xlu0 %v241_v7, %s691_s1 }
 0x138   :  { %247 = vrot.lane.b32.xlu1 %v242_v8, %s691_s1  ;;  %v235_v8 = vrot.slane %v747_v51, 4  ;;  %v467_v51 = vrot.slane %v757_v54, 4 }
 0x13b   :  { %476 = vrot.lane.b32.xlu0 %v472_v9, %s691_s1  ;;  %v236_v9 = vrot.slane %v753_v53, 4 }
 0x13c   :  { %478 = vrot.lane.b32.xlu1 %v473_v10, %s691_s1 }
 0x181   :  { %v180_v13 = vpop.permute.xlu0 %179 }
 0x182   :  { %v415_v14 = vpop.permute.xlu1 %414 }
 0x185   :  { %v182_v15 = vpop.permute.xlu0 %181 }
 0x186   :  { %v417_v16 = vpop.permute.xlu1 %416  ;;  %v184_v17 = vsel %vm183_vm1, %v180_v13, %v182_v15  ;;  %v185_v18 = vsel %vm183_vm1, %v182_v15, %v180_v13 }
 0x187   :  { %v192_v22 = vadd.f32 %v188_v19, %v185_v18  ;;  %v193_v23 = vadd.f32 %v189_v20, %v184_v17  ;;  %v418_v31 = vsel %vm183_vm1, %v415_v14, %v417_v16  ;;  %v419_v32 = vsel %vm183_vm1, %v417_v16, %v415_v14 }
 0x188   :  { %v426_v38 = vadd.f32 %v422_v33, %v419_v32  ;;  %v427_v39 = vadd.f32 %v423_v34, %v418_v31  ;;  %v466_v20 = vrot.slane %v749_v52, 4 }
 0x189   :  { %v199_v21 = vpop.permute.xlu0 %198 }
 0x18a   :  { %v201_v24 = vpop.permute.xlu1 %200 }
 0x18b   :  { %v203_v25 = vsel %vm202_vm2, %v199_v21, %v201_v24  ;;  %v204_v26 = vsel %vm202_vm2, %v201_v24, %v199_v21 }
 0x18c   :  { %v205_v27 = vadd.f32 %v203_v25, %v192_v22  ;;  %v206_v28 = vadd.f32 %v204_v26, %v193_v23 }
 0x18d   :  { %v433_v29 = vpop.permute.xlu0 %432 }
 0x18e   :  { %v435_v30 = vpop.permute.xlu1 %434  ;;  %207 = vrot.lane.b32.xlu0 %v205_v27, %s692_s12  ;;  %209 = vrot.lane.b32.xlu1 %v206_v28, %s692_s12 }
 0x18f   :  { %v436_v35 = vsel %vm202_vm2, %v433_v29, %v435_v30  ;;  %v437_v36 = vsel %vm202_vm2, %v435_v30, %v433_v29 }
 0x190   :  { %v438_v41 = vadd.f32 %v436_v35, %v426_v38  ;;  %v439_v42 = vadd.f32 %v437_v36, %v427_v39 }
 0x191   :  { %v260_v37 = vpop.permute.xlu0 %259 }
 0x192   :  { %v262_v40 = vpop.permute.xlu1 %261  ;;  %214 = vrot.lane.b32.xlu0 %v205_v27, %s693_s13  ;;  %216 = vrot.lane.b32.xlu1 %v206_v28, %s693_s13 }
 0x193   :  { %v263_v45 = vsel %vm183_vm1, %v260_v37, %v262_v40  ;;  %v264_v46 = vsel %vm183_vm1, %v262_v40, %v260_v37  ;;  %v48_v37 = vadd.s32 128, %v800_v12  ;;  %v53_v40 = vand.u32 15, %v800_v12 }
 0x194   :  { %v269_v50 = vadd.f32 %v265_v47, %v264_v46  ;;  %v270_v55 = vadd.f32 %v266_v48, %v263_v45 }
 0x195   :  { %v491_v43 = vpop.permute.xlu0 %490  ;;  %vm872_vm5 = vcmp.eq.s32.totalorder %v53_v40, 0  ;;  %vm900_vm8 = vcmp.eq.s32.totalorder %v53_v40, 15 }
 0x196   :  { %v493_v44 = vpop.permute.xlu1 %492  ;;  %440 = vrot.lane.b32.xlu0 %v438_v41, %s692_s12  ;;  %442 = vrot.lane.b32.xlu1 %v439_v42, %s692_s12 }
 0x197   :  { %v494_v63 = vsel %vm183_vm1, %v491_v43, %v493_v44  ;;  %v495_v0 = vsel %vm183_vm1, %v493_v44, %v491_v43 }
 0x198   :  { %v500_v6 = vadd.f32 %v496_v1, %v495_v0  ;;  %v501_v7 = vadd.f32 %v497_v2, %v494_v63 }
 0x199   :  { %v272_v49 = vpop.permute.xlu0 %271 }
 0x19a   :  { %446 = vrot.lane.b32.xlu0 %v438_v41, %s693_s13  ;;  %448 = vrot.lane.b32.xlu1 %v439_v42, %s693_s13  ;;  %v274_v56 = vpop.permute.xlu1 %273  ;;  %v60_v41 = vand.u32 15, %v48_v37 }
 0x19b   :  { %v275_v57 = vsel %vm202_vm2, %v272_v49, %v274_v56  ;;  %v276_v58 = vsel %vm202_vm2, %v274_v56, %v272_v49  ;;  %v78_v56 = vstv %s967_s2  ;;  %s697_s2 = smov [#allocation8]  }
 0x19c   :  { %v277_v59 = vadd.f32 %v275_v57, %v269_v50  ;;  %v278_v60 = vadd.f32 %v276_v58, %v270_v55  ;;  %vm876_vm6 = vcmp.eq.s32.totalorder %v60_v41, 0  ;;  %vm904_vm9 = vcmp.eq.s32.totalorder %v60_v41, 15  ;;  %s552_s18 = sshll.u32 %s697_s2, 4  ;;  %s553_s18 = int_to_ptr.vmem [resolvable:$true] %s552_s18 }
 0x19d   :  { %v503_v61 = vpop.permute.xlu0 %502  ;;  %s656_s19 = scalar_lea.vmem %s553_s18, 64  ;;  %p661_p3 = scmp.lt.s32.totalorder %s553_s18, %s553_s18 }
 0x19e   :  { %281 = vrot.lane.b32.xlu1 %v278_v60, %s694_s14  ;;  %279 = vrot.lane.b32.xlu0 %v277_v59, %s694_s14  ;;  %v505_v62 = vpop.permute.xlu1 %504  ;;  %p657_p2 = scmp.ne.s32.totalorder %s553_s18, %s656_s19  ;;  %p662_p4 = scmp.lt.s32.totalorder %s656_s19, %s656_s19 }
 0x19f   :  { %v506_v3 = vsel %vm202_vm2, %v503_v61, %v505_v62  ;;  %v507_v4 = vsel %vm202_vm2, %v505_v62, %v503_v61 }
 0x1a0   :  { %v508_v15 = vadd.f32 %v506_v3, %v500_v6  ;;  %v509_v16 = vadd.f32 %v507_v4, %v501_v7  ;;  %p663_p5 = por %p662_p4, %p661_p3 }
 0x1a1   :  { %v230_v5 = vpop.permute.xlu0 %229 }
 0x1a2   :  { %288 = vrot.lane.b32.xlu1 %v278_v60, %s695_s15  ;;  %286 = vrot.lane.b32.xlu0 %v277_v59, %s695_s15  ;;  %v232_v10 = vpop.permute.xlu1 %231  ;;  %v696_v59 = vmov 1966171168   ;;  %p664_p6 = pnand %p663_p5, %p657_p2 }
 0x1a3   :  { %v233_v13 = vsel %vm183_vm1, %v230_v5, %v232_v10  ;;  %v234_v14 = vsel %vm183_vm1, %v232_v10, %v230_v5  ;;  %v301_v60 = vunpack.c.l.s4 %v696_v59 }
 0x1a4   :  { %v239_v17 = vadd.f32 %v235_v8, %v234_v14  ;;  %v240_v18 = vadd.f32 %v236_v9, %v233_v13  ;;  %v304_v8 = vshrl.u32 %v46_v11, 7 }
 0x1a5   :  { %v461_v19 = vpop.permute.xlu0 %460  ;;  %v302_v7 = vunpack.c.0.s8 %v301_v60 }
 0x1a6   :  { %512 = vrot.lane.b32.xlu1 %v509_v16, %s694_s14  ;;  %510 = vrot.lane.b32.xlu0 %v508_v15, %s694_s14  ;;  %v463_v21 = vpop.permute.xlu1 %462 }
 0x1a7   :  { %v464_v53 = vsel %vm183_vm1, %v461_v19, %v463_v21  ;;  %v465_v22 = vsel %vm183_vm1, %v463_v21, %v461_v19 }
 0x1a8   :  { %v470_v23 = vadd.f32 %v466_v20, %v465_v22  ;;  %v471_v24 = vadd.f32 %v467_v51, %v464_v53  ;;  %v305_v53 = vsub.s32 %v302_v7, %v304_v8 }
 0x1a9   :  { %v246_v25 = vpop.permute.xlu0 %245 }
 0x1aa   :  { %518 = vrot.lane.b32.xlu1 %v509_v16, %s695_s15  ;;  %516 = vrot.lane.b32.xlu0 %v508_v15, %s695_s15  ;;  %v248_v26 = vpop.permute.xlu1 %247 }
 0x1ab   :  { %v249_v27 = vsel %vm202_vm2, %v246_v25, %v248_v26  ;;  %v250_v52 = vsel %vm202_vm2, %v248_v26, %v246_v25 }
 0x1ac   :  { %v251_v54 = vadd.f32 %v249_v27, %v239_v17  ;;  %v252_v28 = vadd.f32 %v250_v52, %v240_v18 }
 0x1ad   :  { %v477_v29 = vpop.permute.xlu0 %476 }
 0x1ae   :  { %v479_v30 = vpop.permute.xlu1 %478 }
 0x1af   :  { %v480_v31 = vsel %vm202_vm2, %v477_v29, %v479_v30  ;;  %v481_v32 = vsel %vm202_vm2, %v479_v30, %v477_v29 }
 0x1b0   :  { %v864_v33 = vadd.f32 %v480_v31, %v470_v23  ;;  %v866_v34 = vadd.f32 %v481_v32, %v471_v24 }
 0x200   :  { %v208_v35 = vpop.permute.xlu0 %207  ;;  %v210_v36 = vpop.permute.xlu1 %209 }
 0x201   :  { %v212_v48 = vsel %vm211_vm4, %v208_v35, %v210_v36  ;;  %v213_v49 = vsel %vm211_vm4, %v210_v36, %v208_v35 }
 0x204   :  { %v215_v38 = vpop.permute.xlu0 %214  ;;  %v217_v39 = vpop.permute.xlu1 %216 }
 0x205   :  { %v219_v46 = vsel %vm218_vm3, %v215_v38, %v217_v39  ;;  %v220_v47 = vsel %vm218_vm3, %v217_v39, %v215_v38 }
 0x206   :  { %v221_v57 = vsel %vm872_vm5, %v219_v46, %v213_v49  ;;  %v222_v58 = vsel %vm876_vm6, %v220_v47, %v212_v48 }
 0x207   :  { %v223_v61 = vadd.f32 %v221_v57, %v78_v56  ;;  %v224_v62 = vadd.f32 %v222_v58, %v78_v56 }
 0x208   :  { %v441_v42 = vpop.permute.xlu0 %440  ;;  %v443_v43 = vpop.permute.xlu1 %442 }
 0x209   :  { %v444_v5 = vsel %vm211_vm4, %v441_v42, %v443_v43  ;;  %v445_v6 = vsel %vm211_vm4, %v443_v43, %v441_v42  ;;  %v253_v14 = vadd.f32 %v251_v54, %v223_v61  ;;  %v254_v15 = vadd.f32 %v252_v28, %v224_v62 }
 0x20c   :  { %v447_v50 = vpop.permute.xlu0 %446  ;;  %v449_v55 = vpop.permute.xlu1 %448 }
 0x20d   :  { %v450_v1 = vsel %vm218_vm3, %v447_v50, %v449_v55  ;;  %v451_v2 = vsel %vm218_vm3, %v449_v55, %v447_v50 }
 0x20e   :  { %v452_v9 = vsel %vm872_vm5, %v450_v1, %v445_v6  ;;  %v453_v10 = vsel %vm876_vm6, %v451_v2, %v444_v5 }
 0x20f   :  { %v454_v24 = vadd.f32 %v452_v9, %v78_v56  ;;  %v455_v25 = vadd.f32 %v453_v10, %v78_v56 }
 0x210   :  { %v280_v63 = vpop.permute.xlu0 %279  ;;  %v282_v0 = vpop.permute.xlu1 %281 }
 0x211   :  { %v284_v17 = vsel %vm283_vm7, %v280_v63, %v282_v0  ;;  %v285_v18 = vsel %vm283_vm7, %v282_v0, %v280_v63  ;;  %v484_v30 = vadd.f32 %v864_v33, %v454_v24  ;;  %v485_v31 = vadd.f32 %v866_v34, %v455_v25 }
 0x214   :  { %v287_v13 = vpop.permute.xlu0 %286  ;;  %v289_v16 = vpop.permute.xlu1 %288 }
 0x215   :  { %v291_v19 = vsel %vm290_vm10, %v287_v13, %v289_v16  ;;  %v292_v20 = vsel %vm290_vm10, %v289_v16, %v287_v13 }
 0x216   :  { %v293_v51 = vsel %vm900_vm8, %v292_v20, %v284_v17  ;;  %v294_v21 = vsel %vm904_vm9, %v291_v19, %v285_v18 }
 0x217   :  { %v295_v22 = vadd.f32 %v293_v51, %v253_v14  ;;  %v296_v23 = vadd.f32 %v294_v21, %v254_v15 }
 0x218   :  { %v511_v26 = vpop.permute.xlu0 %510  ;;  %v513_v27 = vpop.permute.xlu1 %512 }
 0x219   :  { %v299_v52 = vcombine.low %v295_v22, %v296_v23  ;;  %v514_v28 = vsel %vm283_vm7, %v511_v26, %v513_v27  ;;  %v515_v36 = vsel %vm283_vm7, %v513_v27, %v511_v26 }
 0x21b   :  { %v306_v54 = vrot.slane %v299_v52, %v305_v53 }
 0x21c   :  { %v517_v29 = vpop.permute.xlu0 %516  ;;  %v519_v32 = vpop.permute.xlu1 %518 }
 0x21d   :  { %v520_v37 = vsel %vm290_vm10, %v517_v29, %v519_v32  ;;  %v521_v38 = vsel %vm290_vm10, %v519_v32, %v517_v29  ;;  %v313_v39 = vrot.slane %v306_v54, %v305_v53 }
 0x21e   :  { %v522_v33 = vsel %vm900_vm8, %v521_v38, %v514_v28  ;;  %v523_v34 = vsel %vm904_vm9, %v520_v37, %v515_v36 }
 0x21f   :  { %v524_v11 = vadd.f32 %v522_v33, %v484_v30  ;;  %v525_v40 = vadd.f32 %v523_v34, %v485_v31  ;;  %319 = vst.msk [vmem:[#allocation8] ss:$2 sm:$0x3] %vm935_vm11, %v313_v39 }
 0x221   :  { %v528_v41 = vcombine.low %v524_v11, %v525_v40 }
 0x223   :  { %v535_v42 = vrot.slane %v528_v41, %v305_v53 }
 0x225   :  { %v542_v43 = vrot.slane %v535_v42, %v305_v53 }
 0x227   :  { %545 = vst.msk [vmem:[#allocation8 + $0x1] ss:$2 sm:$0x3] %vm935_vm11, %v542_v43 }
 0x228   :  { %667 = shalt.err (!%p664_p6)
}
 0x229   :  { %s668_s22 = scalar_lea.hbm %s968_s3, 64 }
 0x22a   :  { %p669_p7 = scmp.ne.s32.totalorder %s968_s3, %s668_s22  ;;  %p672_p8 = scmp.lt.u32.totalorder %s668_s22, %s968_s3 }
 0x22c   :  { %p674_p9 = pnand %p672_p8, %p669_p7 }
 0x22e   :  { %677 = shalt.err (!%p674_p9)
}
 0x22f   :  { %555 = dma.vmem_to_hbm [thread:$0]  %s553_s18, 64, %s968_s3, [#allocation5]  }
 0x230   :  { %682 = dma.done.wait [#allocation5], 64  }
 0x231   :  { %683 = vsyncadd [#allocation5], 4294967232 }
 0x232   :  { %559 = vsyncpa [#allocation4], 1 }
 0x233   :  { %560 = vsyncpa [#allocation7], 1 }
 0x234   :  { %561 = vsyncpa [#allocation5], 1 }

</bundles_post_ra>
